<compile_context>
chip_gen: v5e
topology: v5e:2x2
jax: 0.10.0
libtpu: 0.0.40
codegen_flags: <defaults>
</compile_context>

<pallas_src>
import jax
import jax.numpy as jnp
from jax.experimental import pallas as pl
from jax.experimental.pallas import tpu as pltpu


# --------------------------- stage 1: flat matmuls ---------------------------

def _stage1_kernel(high_ref, low_ref, w_cbr_ref, bn_s_ref, bn_b_ref,
                   w_scale_ref, w_high_ref, w_low_ref, bias_ref,
                   y_ref, lo_ref):
    # high_ref: (Ch, Sh) f32    low_ref: (Cl, Sl) f32
    high_f32 = high_ref[...]
    high_bf = high_f32.astype(jnp.bfloat16)          # in-kernel cast at the MXU

    # scale branch: AdaptiveAvgPool2d(1) -> 1x1 conv -> sigmoid (per image)
    avg = jnp.mean(high_f32, axis=1, keepdims=True)                   # (Ch, 1)
    s = jax.nn.sigmoid(jnp.dot(w_scale_ref[...], avg,
                               preferred_element_type=jnp.float32))   # (Ci, 1)

    # cbr branch: 1x1 conv (no bias) -> folded BatchNorm -> ReLU, with the
    # sigmoid gate folded into the BN affine (s > 0 => relu(a)*s == relu(a*s)).
    x = jnp.dot(w_cbr_ref[...], high_bf,
                preferred_element_type=jnp.float32)                   # (Ci, Sh)
    x = jnp.maximum(x * (bn_s_ref[...] * s) + bn_b_ref[...] * s, 0.0)

    # high_classifier BEFORE upsampling (1x1 conv commutes with interpolation)
    y_ref[...] = jnp.dot(w_high_ref[...], x.astype(jnp.bfloat16),
                         preferred_element_type=jnp.float32
                         ).astype(y_ref.dtype)                        # (K, Sh)

    # low_classifier + fused (b_low + b_high) bias, lane-dense (K, Sl) output.
    lo_ref[...] = (jnp.dot(w_low_ref[...], low_ref[...].astype(jnp.bfloat16),
                           preferred_element_type=jnp.float32)
                   + bias_ref[...])                                   # (K, Sl)


# --------------------- stage 2: separable bilinear + add ---------------------

def _stage2_kernel(y_ref, lo_ref, ah_ref, bw_ref, out_ref):
    # y_ref:  (K*Hh, Wh) bf16     lo_ref / out_ref: (K, Hl, Wl) f32
    # ah_ref: (Hl, Hh)   bf16     bw_ref:           (Wh, Wl)    bf16
    k, hl, wl = out_ref.shape
    hh = y_ref.shape[0] // k

    # width pass: one big-M MXU matmul covering all classes at once
    z = jnp.dot(y_ref[...], bw_ref[...],
                preferred_element_type=jnp.float32)                   # (K*Hh, Wl)

    ah = ah_ref[...]
    for kk in range(k):     # height pass: K small matmuls sharing (Hl, Hh)
        u = jnp.dot(ah, z[kk * hh:(kk + 1) * hh, :].astype(jnp.bfloat16),
                    preferred_element_type=jnp.float32)               # (Hl, Wl)
        out_ref[kk] = lo_ref[kk] + u


# ------------------------------- host wrapper --------------------------------

def _bilinear_matrix(l_out, l_in):
    # PyTorch F.interpolate(mode='bilinear', align_corners=False) 1-D weights.
    scale = l_in / l_out
    dst = jnp.arange(l_out, dtype=jnp.float32)
    src = jnp.maximum((dst + 0.5) * scale - 0.5, 0.0)   # clamp negative src
    i0 = jnp.clip(jnp.floor(src).astype(jnp.int32), 0, l_in - 1)
    i1 = jnp.minimum(i0 + 1, l_in - 1)
    w = src - i0.astype(jnp.float32)
    rows = jnp.arange(l_out)
    a = jnp.zeros((l_out, l_in), jnp.float32)
    a = a.at[rows, i0].add(1.0 - w)
    a = a.at[rows, i1].add(w)
    return a


def lraspp_head(low_nchw, high_nchw, params):
    """Pallas LRASPPHead forward. Inputs are NCHW f32, output is NCHW f32."""
    n, cl, hl, wl = low_nchw.shape
    _, ch, hh, wh = high_nchw.shape
    ci = params["w_cbr"].shape[1]
    k = params["w_low"].shape[1]
    sh, sl = hh * wh, hl * wl

    # channel-major, spatially-flat views: metadata-only reshapes, f32 kept.
    high = high_nchw.reshape(n, ch, sh)
    low = low_nchw.reshape(n, cl, sl)

    # 1x1-conv weights transposed to (C_out, C_in) for channel-major matmuls.
    w_cbr_t = params["w_cbr"].T.astype(jnp.bfloat16)        # (Ci, Ch)
    w_scale_t = params["w_scale"].T.astype(jnp.float32)     # (Ci, Ch) tiny, f32
    w_high_t = params["w_high"].T.astype(jnp.bfloat16)      # (K, Ci)
    w_low_t = params["w_low"].T.astype(jnp.bfloat16)        # (K, Cl)
    bn_s = params["bn_scale"].reshape(ci, 1).astype(jnp.float32)
    bn_b = params["bn_bias"].reshape(ci, 1).astype(jnp.float32)
    bias = (params["b_low"] + params["b_high"]).reshape(k, 1).astype(jnp.float32)

    def const(shape):
        zeros = (0,) * len(shape)
        return pl.BlockSpec(shape, lambda b: zeros)

    # ---------------- stage 1 ----------------
    flops1 = 2 * n * (ci * ch * sh + ci * ch + k * ci * sh + k * cl * sl)
    bytes1 = (4 * (high.size + low.size) + 2 * n * k * sh + 4 * n * k * sl
              + 2 * (w_cbr_t.size + w_high_t.size + w_low_t.size)
              + 4 * (w_scale_t.size + 2 * ci + k))

    y_flat, lo_flat = pl.pallas_call(
        _stage1_kernel,
        out_shape=(jax.ShapeDtypeStruct((n, k, sh), jnp.bfloat16),
                   jax.ShapeDtypeStruct((n, k, sl), jnp.float32)),
        grid=(n,),
        in_specs=[
            pl.BlockSpec((None, ch, sh), lambda b: (b, 0, 0)),   # high (per img)
            pl.BlockSpec((None, cl, sl), lambda b: (b, 0, 0)),   # low  (per img)
            const((ci, ch)),                                     # w_cbr^T
            const((ci, 1)),                                      # folded BN scale
            const((ci, 1)),                                      # folded BN bias
            const((ci, ch)),                                     # w_scale^T
            const((k, ci)),                                      # w_high^T
            const((k, cl)),                                      # w_low^T
            const((k, 1)),                                       # fused bias
        ],
        out_specs=(pl.BlockSpec((None, k, sh), lambda b: (b, 0, 0)),
                   pl.BlockSpec((None, k, sl), lambda b: (b, 0, 0))),
        compiler_params=pltpu.CompilerParams(
            dimension_semantics=("parallel",)),
        cost_estimate=pl.CostEstimate(flops=flops1, transcendentals=n * ci,
                                      bytes_accessed=bytes1),
    )(high, low, w_cbr_t, bn_s, bn_b, w_scale_t, w_high_t, w_low_t, bias)

    # ---------------- stage 2 ----------------
    # separable bilinear weights (NOT broadcast over K), bf16 for the MXU.
    a_h = _bilinear_matrix(hl, hh).astype(jnp.bfloat16)      # (Hl, Hh)
    b_w = _bilinear_matrix(wl, wh).T.astype(jnp.bfloat16)    # (Wh, Wl)

    # free metadata re-views of the stage-1 outputs
    y_v = y_flat.reshape(n, k * hh, wh)
    lo_v = lo_flat.reshape(n, k, hl, wl)

    flops2 = 2 * n * k * (hh * wh * wl + hl * hh * wl)
    bytes2 = (2 * y_v.size + 4 * lo_v.size + 4 * n * k * hl * wl
              + 2 * (a_h.size + b_w.size))

    out = pl.pallas_call(
        _stage2_kernel,
        out_shape=jax.ShapeDtypeStruct((n, k, hl, wl), jnp.float32),
        grid=(n,),
        in_specs=[
            pl.BlockSpec((None, k * hh, wh), lambda b: (b, 0, 0)),     # y view
            pl.BlockSpec((None, k, hl, wl), lambda b: (b, 0, 0, 0)),   # lo view
            const((hl, hh)),                                           # height interp
            const((wh, wl)),                                           # width interp
        ],
        out_specs=pl.BlockSpec((None, k, hl, wl), lambda b: (b, 0, 0, 0)),
        compiler_params=pltpu.CompilerParams(
            dimension_semantics=("parallel",)),
        cost_estimate=pl.CostEstimate(flops=flops2, transcendentals=0,
                                      bytes_accessed=bytes2),
    )(y_v, lo_v, a_h, b_w)

    return out   # (N, K, Hl, Wl) == NCHW


# ---------------- pure-JAX f32 reference (for correctness check) ----------------

def _bilinear_resize_ref(x_nchw, hl, wl):
    n, c, hh, wh = x_nchw.shape

    def idx(l_out, l_in):
        scale = l_in / l_out
        src = (jnp.arange(l_out, dtype=jnp.float32) + 0.5) * scale - 0.5
        src = jnp.maximum(src, 0.0)
        i0 = jnp.clip(jnp.floor(src).astype(jnp.int32), 0, l_in - 1)
        i1 = jnp.minimum(i0 + 1, l_in - 1)
        w = src - i0.astype(jnp.float32)
        return i0, i1, w

    h0, h1, wy = idx(hl, hh)
    w0, w1, wx = idx(wl, wh)
    top = x_nchw[:, :, h0][:, :, :, w0] * (1 - wx) + x_nchw[:, :, h0][:, :, :, w1] * wx
    bot = x_nchw[:, :, h1][:, :, :, w0] * (1 - wx) + x_nchw[:, :, h1][:, :, :, w1] * wx
    return top * (1 - wy)[:, None] + bot * wy[:, None]


def lraspp_head_ref(low, high, params, hl, wl):
    x = jnp.einsum('nchw,cd->ndhw', high, params['w_cbr'])
    x = x * params['bn_scale'][None, :, None, None] + params['bn_bias'][None, :, None, None]
    x = jnp.maximum(x, 0.0)
    avg = jnp.mean(high, axis=(2, 3))                         # (n, Ch)
    s = jax.nn.sigmoid(avg @ params['w_scale'])               # (n, Ci)
    x = x * s[:, :, None, None]
    x = _bilinear_resize_ref(x, hl, wl)
    out = (jnp.einsum('nchw,ck->nkhw', low, params['w_low'])
           + params['b_low'][None, :, None, None]
           + jnp.einsum('nchw,ck->nkhw', x, params['w_high'])
           + params['b_high'][None, :, None, None])
    return out


if __name__ == "__main__":
    N = 2
    LOW_C, HIGH_C, INTER_C, NUM_CLASSES = 8, 16, 32, 6
    HH = WH = 16         # high-resolution branch spatial size (smaller)
    HL = WL = 32         # low-level feature spatial size (= output size)

    key = jax.random.PRNGKey(0)
    keys = jax.random.split(key, 12)

    low = jax.random.normal(keys[0], (N, LOW_C, HL, WL), jnp.float32)
    high = jax.random.normal(keys[1], (N, HIGH_C, HH, WH), jnp.float32)

    # Deterministic synthetic parameters. 1x1 conv weights stored as (C_in, C_out).
    # BatchNorm2d uses eval-mode semantics, folded into scale/bias.
    w_cbr = 0.1 * jax.random.normal(keys[2], (HIGH_C, INTER_C), jnp.float32)
    gamma = 1.0 + 0.1 * jax.random.normal(keys[3], (INTER_C,), jnp.float32)
    beta = 0.1 * jax.random.normal(keys[4], (INTER_C,), jnp.float32)
    run_mean = 0.1 * jax.random.normal(keys[5], (INTER_C,), jnp.float32)
    run_var = jax.random.uniform(keys[6], (INTER_C,), jnp.float32, 0.5, 1.5)
    eps = 1e-5
    bn_scale = gamma / jnp.sqrt(run_var + eps)
    bn_bias = beta - run_mean * bn_scale

    w_scale = 0.1 * jax.random.normal(keys[7], (HIGH_C, INTER_C), jnp.float32)
    w_low = 0.1 * jax.random.normal(keys[8], (LOW_C, NUM_CLASSES), jnp.float32)
    b_low = 0.1 * jax.random.normal(keys[9], (NUM_CLASSES,), jnp.float32)
    w_high = 0.1 * jax.random.normal(keys[10], (INTER_C, NUM_CLASSES), jnp.float32)
    b_high = 0.1 * jax.random.normal(keys[11], (NUM_CLASSES,), jnp.float32)

    params = dict(w_cbr=w_cbr, bn_scale=bn_scale, bn_bias=bn_bias,
                  w_scale=w_scale, w_low=w_low, b_low=b_low,
                  w_high=w_high, b_high=b_high)

    out = jax.jit(lraspp_head)(low, high, params)
    out = jax.block_until_ready(out)

    ref = lraspp_head_ref(low, high, params, HL, WL)
    assert out.shape == (N, NUM_CLASSES, HL, WL)
    max_diff = float(jnp.max(jnp.abs(out - ref)))
    # bf16 MXU operands with f32 accumulation -> loose-ish tolerance
    assert jnp.allclose(out, ref, rtol=3e-2, atol=3e-2), \
        f"max abs diff {max_diff}"

    print("KERNEL_OK")
</pallas_src>

<mosaic_0001>
module attributes {stable_mosaic.version = 11 : i64} {
  func.func @_stage1_kernel(%arg0: i32, %arg1: memref<1x16x256xf32, #tpu.memory_space<vmem>>, %arg2: memref<1x8x1024xf32, #tpu.memory_space<vmem>>, %arg3: memref<32x16xbf16, #tpu.memory_space<vmem>>, %arg4: memref<32x1xf32, #tpu.memory_space<vmem>>, %arg5: memref<32x1xf32, #tpu.memory_space<vmem>>, %arg6: memref<32x16xf32, #tpu.memory_space<vmem>>, %arg7: memref<6x32xbf16, #tpu.memory_space<vmem>>, %arg8: memref<6x8xbf16, #tpu.memory_space<vmem>>, %arg9: memref<6x1xf32, #tpu.memory_space<vmem>>, %arg10: memref<1x6x256xbf16, #tpu.memory_space<vmem>>, %arg11: memref<1x6x1024xf32, #tpu.memory_space<vmem>>) attributes {dimension_semantics = [#tpu.dimension_semantics<parallel>], iteration_bounds = array<i64: 2>, scalar_prefetch = 0 : i64, scratch_operands = 0 : i64, tpu.core_type = #tpu.core_type<tc>, window_params = [{transform_indices = @transform_0, window_bounds = array<i64: 1, 16, 256>}, {transform_indices = @transform_1, window_bounds = array<i64: 1, 8, 1024>}, {pipeline_mode = #tpu.pipeline_mode<synchronous>, transform_indices = @transform_2, window_bounds = array<i64: 32, 16>}, {pipeline_mode = #tpu.pipeline_mode<synchronous>, transform_indices = @transform_3, window_bounds = array<i64: 32, 1>}, {pipeline_mode = #tpu.pipeline_mode<synchronous>, transform_indices = @transform_4, window_bounds = array<i64: 32, 1>}, {pipeline_mode = #tpu.pipeline_mode<synchronous>, transform_indices = @transform_5, window_bounds = array<i64: 32, 16>}, {pipeline_mode = #tpu.pipeline_mode<synchronous>, transform_indices = @transform_6, window_bounds = array<i64: 6, 32>}, {pipeline_mode = #tpu.pipeline_mode<synchronous>, transform_indices = @transform_7, window_bounds = array<i64: 6, 8>}, {pipeline_mode = #tpu.pipeline_mode<synchronous>, transform_indices = @transform_8, window_bounds = array<i64: 6, 1>}, {transform_indices = @transform_9, window_bounds = array<i64: 1, 6, 256>}, {transform_indices = @transform_10, window_bounds = array<i64: 1, 6, 1024>}]} {
    %c0 = arith.constant 0 : index
    %c0_0 = arith.constant 0 : index
    %c0_1 = arith.constant 0 : index
    %0 = vector.load %arg1[%c0, %c0_0, %c0_1] : memref<1x16x256xf32, #tpu.memory_space<vmem>>, vector<1x16x256xf32>
    %1 = vector.shape_cast %0 : vector<1x16x256xf32> to vector<16x256xf32>
    %2 = arith.truncf %1 : vector<16x256xf32> to vector<16x256xbf16>
    %cst = arith.constant dense<0.000000e+00> : vector<16xf32>
    %3 = vector.multi_reduction <add>, %1, %cst [1] : vector<16x256xf32> to vector<16xf32>
    %4 = vector.shape_cast %3 : vector<16xf32> to vector<16x1xf32>
    %cst_2 = arith.constant 2.560000e+02 : f32
    %5 = vector.broadcast %cst_2 : f32 to vector<16x1xf32>
    %6 = arith.divf %4, %5 : vector<16x1xf32>
    %c0_3 = arith.constant 0 : index
    %c0_4 = arith.constant 0 : index
    %7 = vector.load %arg6[%c0_3, %c0_4] : memref<32x16xf32, #tpu.memory_space<vmem>>, vector<32x16xf32>
    %cst_5 = arith.constant dense<0.000000e+00> : vector<32x1xf32>
    %8 = tpu.matmul %7, %6, %cst_5 {dimension_numbers = #tpu.dot_dimension_numbers<[1], [0], [0], [1], [0, 0, 1, 1], [], []>} : vector<32x16xf32>, vector<16x1xf32>, vector<32x1xf32> -> vector<32x1xf32>
    %9 = arith.negf %8 : vector<32x1xf32>
    %10 = math.exp %9 : vector<32x1xf32>
    %cst_6 = arith.constant 1.000000e+00 : f32
    %11 = vector.broadcast %cst_6 : f32 to vector<32x1xf32>
    %12 = arith.addf %11, %10 : vector<32x1xf32>
    %13 = arith.divf %11, %12 : vector<32x1xf32>
    %c0_7 = arith.constant 0 : index
    %c0_8 = arith.constant 0 : index
    %14 = vector.load %arg3[%c0_7, %c0_8] : memref<32x16xbf16, #tpu.memory_space<vmem>>, vector<32x16xbf16>
    %cst_9 = arith.constant dense<0.000000e+00> : vector<32x256xf32>
    %15 = tpu.matmul %14, %2, %cst_9 {dimension_numbers = #tpu.dot_dimension_numbers<[1], [0], [0], [1], [0, 0, 1, 1], [], []>} : vector<32x16xbf16>, vector<16x256xbf16>, vector<32x256xf32> -> vector<32x256xf32>
    %c0_10 = arith.constant 0 : index
    %c0_11 = arith.constant 0 : index
    %16 = vector.load %arg4[%c0_10, %c0_11] : memref<32x1xf32, #tpu.memory_space<vmem>>, vector<32x1xf32>
    %17 = arith.mulf %16, %13 : vector<32x1xf32>
    %18 = vector.broadcast %17 : vector<32x1xf32> to vector<32x256xf32>
    %19 = arith.mulf %15, %18 : vector<32x256xf32>
    %c0_12 = arith.constant 0 : index
    %c0_13 = arith.constant 0 : index
    %20 = vector.load %arg5[%c0_12, %c0_13] : memref<32x1xf32, #tpu.memory_space<vmem>>, vector<32x1xf32>
    %21 = arith.mulf %20, %13 : vector<32x1xf32>
    %22 = vector.broadcast %21 : vector<32x1xf32> to vector<32x256xf32>
    %23 = arith.addf %19, %22 : vector<32x256xf32>
    %cst_14 = arith.constant 0.000000e+00 : f32
    %24 = vector.broadcast %cst_14 : f32 to vector<32x256xf32>
    %25 = arith.maximumf %23, %24 : vector<32x256xf32>
    %c0_15 = arith.constant 0 : index
    %c0_16 = arith.constant 0 : index
    %26 = vector.load %arg7[%c0_15, %c0_16] : memref<6x32xbf16, #tpu.memory_space<vmem>>, vector<6x32xbf16>
    %27 = arith.truncf %25 : vector<32x256xf32> to vector<32x256xbf16>
    %cst_17 = arith.constant dense<0.000000e+00> : vector<6x256xf32>
    %28 = tpu.matmul %26, %27, %cst_17 {dimension_numbers = #tpu.dot_dimension_numbers<[1], [0], [0], [1], [0, 0, 1, 1], [], []>} : vector<6x32xbf16>, vector<32x256xbf16>, vector<6x256xf32> -> vector<6x256xf32>
    %29 = arith.truncf %28 : vector<6x256xf32> to vector<6x256xbf16>
    %c0_18 = arith.constant 0 : index
    %c0_19 = arith.constant 0 : index
    %c0_20 = arith.constant 0 : index
    %30 = vector.load %arg10[%c0_18, %c0_19, %c0_20] : memref<1x6x256xbf16, #tpu.memory_space<vmem>>, vector<1x6x256xbf16>
    %31 = vector.shape_cast %30 : vector<1x6x256xbf16> to vector<6x256xbf16>
    %32 = vector.shape_cast %29 : vector<6x256xbf16> to vector<1x6x256xbf16>
    tpu.vector_store %arg10[%c0_18, %c0_19, %c0_20], %32 {strides = array<i32>} : memref<1x6x256xbf16, #tpu.memory_space<vmem>>, vector<1x6x256xbf16>,
    %c0_21 = arith.constant 0 : index
    %c0_22 = arith.constant 0 : index
    %33 = vector.load %arg8[%c0_21, %c0_22] : memref<6x8xbf16, #tpu.memory_space<vmem>>, vector<6x8xbf16>
    %c0_23 = arith.constant 0 : index
    %c0_24 = arith.constant 0 : index
    %c0_25 = arith.constant 0 : index
    %34 = vector.load %arg2[%c0_23, %c0_24, %c0_25] : memref<1x8x1024xf32, #tpu.memory_space<vmem>>, vector<1x8x1024xf32>
    %35 = vector.shape_cast %34 : vector<1x8x1024xf32> to vector<8x1024xf32>
    %36 = arith.truncf %35 : vector<8x1024xf32> to vector<8x1024xbf16>
    %cst_26 = arith.constant dense<0.000000e+00> : vector<6x1024xf32>
    %37 = tpu.matmul %33, %36, %cst_26 {dimension_numbers = #tpu.dot_dimension_numbers<[1], [0], [0], [1], [0, 0, 1, 1], [], []>} : vector<6x8xbf16>, vector<8x1024xbf16>, vector<6x1024xf32> -> vector<6x1024xf32>
    %c0_27 = arith.constant 0 : index
    %c0_28 = arith.constant 0 : index
    %38 = vector.load %arg9[%c0_27, %c0_28] : memref<6x1xf32, #tpu.memory_space<vmem>>, vector<6x1xf32>
    %39 = vector.broadcast %38 : vector<6x1xf32> to vector<6x1024xf32>
    %40 = arith.addf %37, %39 : vector<6x1024xf32>
    %c0_29 = arith.constant 0 : index
    %c0_30 = arith.constant 0 : index
    %c0_31 = arith.constant 0 : index
    %41 = vector.load %arg11[%c0_29, %c0_30, %c0_31] : memref<1x6x1024xf32, #tpu.memory_space<vmem>>, vector<1x6x1024xf32>
    %42 = vector.shape_cast %41 : vector<1x6x1024xf32> to vector<6x1024xf32>
    %43 = vector.shape_cast %40 : vector<6x1024xf32> to vector<1x6x1024xf32>
    tpu.vector_store %arg11[%c0_29, %c0_30, %c0_31], %43 {strides = array<i32>} : memref<1x6x1024xf32, #tpu.memory_space<vmem>>, vector<1x6x1024xf32>,
    return
  }
  func.func @transform_0(%arg0: i32) -> (i32, i32, i32) {
    %c0_i32 = arith.constant 0 : i32
    %c0_i32_0 = arith.constant 0 : i32
    %c0_i32_1 = arith.constant 0 : i32
    return %arg0, %c0_i32, %c0_i32_0 : i32, i32, i32
  }
  func.func @transform_1(%arg0: i32) -> (i32, i32, i32) {
    %c0_i32 = arith.constant 0 : i32
    %c0_i32_0 = arith.constant 0 : i32
    %c0_i32_1 = arith.constant 0 : i32
    return %arg0, %c0_i32, %c0_i32_0 : i32, i32, i32
  }
  func.func @transform_2(%arg0: i32) -> (i32, i32) {
    %c0_i32 = arith.constant 0 : i32
    %c0_i32_0 = arith.constant 0 : i32
    %c0_i32_1 = arith.constant 0 : i32
    return %c0_i32, %c0_i32_0 : i32, i32
  }
  func.func @transform_3(%arg0: i32) -> (i32, i32) {
    %c0_i32 = arith.constant 0 : i32
    %c0_i32_0 = arith.constant 0 : i32
    %c0_i32_1 = arith.constant 0 : i32
    return %c0_i32, %c0_i32_0 : i32, i32
  }
  func.func @transform_4(%arg0: i32) -> (i32, i32) {
    %c0_i32 = arith.constant 0 : i32
    %c0_i32_0 = arith.constant 0 : i32
    %c0_i32_1 = arith.constant 0 : i32
    return %c0_i32, %c0_i32_0 : i32, i32
  }
  func.func @transform_5(%arg0: i32) -> (i32, i32) {
    %c0_i32 = arith.constant 0 : i32
    %c0_i32_0 = arith.constant 0 : i32
    %c0_i32_1 = arith.constant 0 : i32
    return %c0_i32, %c0_i32_0 : i32, i32
  }
  func.func @transform_6(%arg0: i32) -> (i32, i32) {
    %c0_i32 = arith.constant 0 : i32
    %c0_i32_0 = arith.constant 0 : i32
    %c0_i32_1 = arith.constant 0 : i32
    return %c0_i32, %c0_i32_0 : i32, i32
  }
  func.func @transform_7(%arg0: i32) -> (i32, i32) {
    %c0_i32 = arith.constant 0 : i32
    %c0_i32_0 = arith.constant 0 : i32
    %c0_i32_1 = arith.constant 0 : i32
    return %c0_i32, %c0_i32_0 : i32, i32
  }
  func.func @transform_8(%arg0: i32) -> (i32, i32) {
    %c0_i32 = arith.constant 0 : i32
    %c0_i32_0 = arith.constant 0 : i32
    %c0_i32_1 = arith.constant 0 : i32
    return %c0_i32, %c0_i32_0 : i32, i32
  }
  func.func @transform_9(%arg0: i32) -> (i32, i32, i32) {
    %c0_i32 = arith.constant 0 : i32
    %c0_i32_0 = arith.constant 0 : i32
    %c0_i32_1 = arith.constant 0 : i32
    return %arg0, %c0_i32, %c0_i32_0 : i32, i32, i32
  }
  func.func @transform_10(%arg0: i32) -> (i32, i32, i32) {
    %c0_i32 = arith.constant 0 : i32
    %c0_i32_0 = arith.constant 0 : i32
    %c0_i32_1 = arith.constant 0 : i32
    return %arg0, %c0_i32, %c0_i32_0 : i32, i32, i32
  }
}

module attributes {stable_mosaic.version = 11 : i64} {
  func.func @_stage2_kernel(%arg0: i32, %arg1: memref<1x96x16xbf16, #tpu.memory_space<vmem>>, %arg2: memref<1x6x32x32xf32, #tpu.memory_space<vmem>>, %arg3: memref<32x16xbf16, #tpu.memory_space<vmem>>, %arg4: memref<16x32xbf16, #tpu.memory_space<vmem>>, %arg5: memref<1x6x32x32xf32, #tpu.memory_space<vmem>>) attributes {dimension_semantics = [#tpu.dimension_semantics<parallel>], iteration_bounds = array<i64: 2>, scalar_prefetch = 0 : i64, scratch_operands = 0 : i64, tpu.core_type = #tpu.core_type<tc>, window_params = [{transform_indices = @transform_0, window_bounds = array<i64: 1, 96, 16>}, {transform_indices = @transform_1, window_bounds = array<i64: 1, 6, 32, 32>}, {pipeline_mode = #tpu.pipeline_mode<synchronous>, transform_indices = @transform_2, window_bounds = array<i64: 32, 16>}, {pipeline_mode = #tpu.pipeline_mode<synchronous>, transform_indices = @transform_3, window_bounds = array<i64: 16, 32>}, {transform_indices = @transform_4, window_bounds = array<i64: 1, 6, 32, 32>}]} {
    %c0 = arith.constant 0 : index
    %c0_0 = arith.constant 0 : index
    %c0_1 = arith.constant 0 : index
    %0 = vector.load %arg1[%c0, %c0_0, %c0_1] : memref<1x96x16xbf16, #tpu.memory_space<vmem>>, vector<1x96x16xbf16>
    %1 = vector.shape_cast %0 : vector<1x96x16xbf16> to vector<96x16xbf16>
    %c0_2 = arith.constant 0 : index
    %c0_3 = arith.constant 0 : index
    %2 = vector.load %arg4[%c0_2, %c0_3] : memref<16x32xbf16, #tpu.memory_space<vmem>>, vector<16x32xbf16>
    %cst = arith.constant dense<0.000000e+00> : vector<96x32xf32>
    %3 = tpu.matmul %1, %2, %cst {dimension_numbers = #tpu.dot_dimension_numbers<[1], [0], [0], [1], [0, 0, 1, 1], [], []>} : vector<96x16xbf16>, vector<16x32xbf16>, vector<96x32xf32> -> vector<96x32xf32>
    %c0_4 = arith.constant 0 : index
    %c0_5 = arith.constant 0 : index
    %4 = vector.load %arg3[%c0_4, %c0_5] : memref<32x16xbf16, #tpu.memory_space<vmem>>, vector<32x16xbf16>
    %5 = vector.extract_strided_slice %3 {offsets = [0, 0], sizes = [16, 32], strides = [1, 1]} : vector<96x32xf32> to vector<16x32xf32>
    %6 = arith.truncf %5 : vector<16x32xf32> to vector<16x32xbf16>
    %cst_6 = arith.constant dense<0.000000e+00> : vector<32x32xf32>
    %7 = tpu.matmul %4, %6, %cst_6 {dimension_numbers = #tpu.dot_dimension_numbers<[1], [0], [0], [1], [0, 0, 1, 1], [], []>} : vector<32x16xbf16>, vector<16x32xbf16>, vector<32x32xf32> -> vector<32x32xf32>
    %c0_7 = arith.constant 0 : index
    %c0_8 = arith.constant 0 : index
    %c0_9 = arith.constant 0 : index
    %c0_10 = arith.constant 0 : index
    %8 = vector.load %arg2[%c0_7, %c0_8, %c0_9, %c0_10] : memref<1x6x32x32xf32, #tpu.memory_space<vmem>>, vector<1x1x32x32xf32>
    %9 = vector.shape_cast %8 : vector<1x1x32x32xf32> to vector<32x32xf32>
    %10 = arith.addf %9, %7 : vector<32x32xf32>
    %c0_11 = arith.constant 0 : index
    %c0_12 = arith.constant 0 : index
    %c0_13 = arith.constant 0 : index
    %c0_14 = arith.constant 0 : index
    %11 = vector.load %arg5[%c0_11, %c0_12, %c0_13, %c0_14] : memref<1x6x32x32xf32, #tpu.memory_space<vmem>>, vector<1x1x32x32xf32>
    %12 = vector.shape_cast %11 : vector<1x1x32x32xf32> to vector<32x32xf32>
    %13 = vector.shape_cast %10 : vector<32x32xf32> to vector<1x1x32x32xf32>
    tpu.vector_store %arg5[%c0_11, %c0_12, %c0_13, %c0_14], %13 {strides = array<i32>} : memref<1x6x32x32xf32, #tpu.memory_space<vmem>>, vector<1x1x32x32xf32>,
    %14 = vector.extract_strided_slice %3 {offsets = [16, 0], sizes = [16, 32], strides = [1, 1]} : vector<96x32xf32> to vector<16x32xf32>
    %15 = arith.truncf %14 : vector<16x32xf32> to vector<16x32xbf16>
    %cst_15 = arith.constant dense<0.000000e+00> : vector<32x32xf32>
    %16 = tpu.matmul %4, %15, %cst_15 {dimension_numbers = #tpu.dot_dimension_numbers<[1], [0], [0], [1], [0, 0, 1, 1], [], []>} : vector<32x16xbf16>, vector<16x32xbf16>, vector<32x32xf32> -> vector<32x32xf32>
    %c0_16 = arith.constant 0 : index
    %c1 = arith.constant 1 : index
    %c0_17 = arith.constant 0 : index
    %c0_18 = arith.constant 0 : index
    %17 = vector.load %arg2[%c0_16, %c1, %c0_17, %c0_18] : memref<1x6x32x32xf32, #tpu.memory_space<vmem>>, vector<1x1x32x32xf32>
    %18 = vector.shape_cast %17 : vector<1x1x32x32xf32> to vector<32x32xf32>
    %19 = arith.addf %18, %16 : vector<32x32xf32>
    %c0_19 = arith.constant 0 : index
    %c1_20 = arith.constant 1 : index
    %c0_21 = arith.constant 0 : index
    %c0_22 = arith.constant 0 : index
    %20 = vector.load %arg5[%c0_19, %c1_20, %c0_21, %c0_22] : memref<1x6x32x32xf32, #tpu.memory_space<vmem>>, vector<1x1x32x32xf32>
    %21 = vector.shape_cast %20 : vector<1x1x32x32xf32> to vector<32x32xf32>
    %22 = vector.shape_cast %19 : vector<32x32xf32> to vector<1x1x32x32xf32>
    tpu.vector_store %arg5[%c0_19, %c1_20, %c0_21, %c0_22], %22 {strides = array<i32>} : memref<1x6x32x32xf32, #tpu.memory_space<vmem>>, vector<1x1x32x32xf32>,
    %23 = vector.extract_strided_slice %3 {offsets = [32, 0], sizes = [16, 32], strides = [1, 1]} : vector<96x32xf32> to vector<16x32xf32>
    %24 = arith.truncf %23 : vector<16x32xf32> to vector<16x32xbf16>
    %cst_23 = arith.constant dense<0.000000e+00> : vector<32x32xf32>
    %25 = tpu.matmul %4, %24, %cst_23 {dimension_numbers = #tpu.dot_dimension_numbers<[1], [0], [0], [1], [0, 0, 1, 1], [], []>} : vector<32x16xbf16>, vector<16x32xbf16>, vector<32x32xf32> -> vector<32x32xf32>
    %c0_24 = arith.constant 0 : index
    %c2 = arith.constant 2 : index
    %c0_25 = arith.constant 0 : index
    %c0_26 = arith.constant 0 : index
    %26 = vector.load %arg2[%c0_24, %c2, %c0_25, %c0_26] : memref<1x6x32x32xf32, #tpu.memory_space<vmem>>, vector<1x1x32x32xf32>
    %27 = vector.shape_cast %26 : vector<1x1x32x32xf32> to vector<32x32xf32>
    %28 = arith.addf %27, %25 : vector<32x32xf32>
    %c0_27 = arith.constant 0 : index
    %c2_28 = arith.constant 2 : index
    %c0_29 = arith.constant 0 : index
    %c0_30 = arith.constant 0 : index
    %29 = vector.load %arg5[%c0_27, %c2_28, %c0_29, %c0_30] : memref<1x6x32x32xf32, #tpu.memory_space<vmem>>, vector<1x1x32x32xf32>
    %30 = vector.shape_cast %29 : vector<1x1x32x32xf32> to vector<32x32xf32>
    %31 = vector.shape_cast %28 : vector<32x32xf32> to vector<1x1x32x32xf32>
    tpu.vector_store %arg5[%c0_27, %c2_28, %c0_29, %c0_30], %31 {strides = array<i32>} : memref<1x6x32x32xf32, #tpu.memory_space<vmem>>, vector<1x1x32x32xf32>,
    %32 = vector.extract_strided_slice %3 {offsets = [48, 0], sizes = [16, 32], strides = [1, 1]} : vector<96x32xf32> to vector<16x32xf32>
    %33 = arith.truncf %32 : vector<16x32xf32> to vector<16x32xbf16>
    %cst_31 = arith.constant dense<0.000000e+00> : vector<32x32xf32>
    %34 = tpu.matmul %4, %33, %cst_31 {dimension_numbers = #tpu.dot_dimension_numbers<[1], [0], [0], [1], [0, 0, 1, 1], [], []>} : vector<32x16xbf16>, vector<16x32xbf16>, vector<32x32xf32> -> vector<32x32xf32>
    %c0_32 = arith.constant 0 : index
    %c3 = arith.constant 3 : index
    %c0_33 = arith.constant 0 : index
    %c0_34 = arith.constant 0 : index
    %35 = vector.load %arg2[%c0_32, %c3, %c0_33, %c0_34] : memref<1x6x32x32xf32, #tpu.memory_space<vmem>>, vector<1x1x32x32xf32>
    %36 = vector.shape_cast %35 : vector<1x1x32x32xf32> to vector<32x32xf32>
    %37 = arith.addf %36, %34 : vector<32x32xf32>
    %c0_35 = arith.constant 0 : index
    %c3_36 = arith.constant 3 : index
    %c0_37 = arith.constant 0 : index
    %c0_38 = arith.constant 0 : index
    %38 = vector.load %arg5[%c0_35, %c3_36, %c0_37, %c0_38] : memref<1x6x32x32xf32, #tpu.memory_space<vmem>>, vector<1x1x32x32xf32>
    %39 = vector.shape_cast %38 : vector<1x1x32x32xf32> to vector<32x32xf32>
    %40 = vector.shape_cast %37 : vector<32x32xf32> to vector<1x1x32x32xf32>
    tpu.vector_store %arg5[%c0_35, %c3_36, %c0_37, %c0_38], %40 {strides = array<i32>} : memref<1x6x32x32xf32, #tpu.memory_space<vmem>>, vector<1x1x32x32xf32>,
    %41 = vector.extract_strided_slice %3 {offsets = [64, 0], sizes = [16, 32], strides = [1, 1]} : vector<96x32xf32> to vector<16x32xf32>
    %42 = arith.truncf %41 : vector<16x32xf32> to vector<16x32xbf16>
    %cst_39 = arith.constant dense<0.000000e+00> : vector<32x32xf32>
    %43 = tpu.matmul %4, %42, %cst_39 {dimension_numbers = #tpu.dot_dimension_numbers<[1], [0], [0], [1], [0, 0, 1, 1], [], []>} : vector<32x16xbf16>, vector<16x32xbf16>, vector<32x32xf32> -> vector<32x32xf32>
    %c0_40 = arith.constant 0 : index
    %c4 = arith.constant 4 : index
    %c0_41 = arith.constant 0 : index
    %c0_42 = arith.constant 0 : index
    %44 = vector.load %arg2[%c0_40, %c4, %c0_41, %c0_42] : memref<1x6x32x32xf32, #tpu.memory_space<vmem>>, vector<1x1x32x32xf32>
    %45 = vector.shape_cast %44 : vector<1x1x32x32xf32> to vector<32x32xf32>
    %46 = arith.addf %45, %43 : vector<32x32xf32>
    %c0_43 = arith.constant 0 : index
    %c4_44 = arith.constant 4 : index
    %c0_45 = arith.constant 0 : index
    %c0_46 = arith.constant 0 : index
    %47 = vector.load %arg5[%c0_43, %c4_44, %c0_45, %c0_46] : memref<1x6x32x32xf32, #tpu.memory_space<vmem>>, vector<1x1x32x32xf32>
    %48 = vector.shape_cast %47 : vector<1x1x32x32xf32> to vector<32x32xf32>
    %49 = vector.shape_cast %46 : vector<32x32xf32> to vector<1x1x32x32xf32>
    tpu.vector_store %arg5[%c0_43, %c4_44, %c0_45, %c0_46], %49 {strides = array<i32>} : memref<1x6x32x32xf32, #tpu.memory_space<vmem>>, vector<1x1x32x32xf32>,
    %50 = vector.extract_strided_slice %3 {offsets = [80, 0], sizes = [16, 32], strides = [1, 1]} : vector<96x32xf32> to vector<16x32xf32>
    %51 = arith.truncf %50 : vector<16x32xf32> to vector<16x32xbf16>
    %cst_47 = arith.constant dense<0.000000e+00> : vector<32x32xf32>
    %52 = tpu.matmul %4, %51, %cst_47 {dimension_numbers = #tpu.dot_dimension_numbers<[1], [0], [0], [1], [0, 0, 1, 1], [], []>} : vector<32x16xbf16>, vector<16x32xbf16>, vector<32x32xf32> -> vector<32x32xf32>
    %c0_48 = arith.constant 0 : index
    %c5 = arith.constant 5 : index
    %c0_49 = arith.constant 0 : index
    %c0_50 = arith.constant 0 : index
    %53 = vector.load %arg2[%c0_48, %c5, %c0_49, %c0_50] : memref<1x6x32x32xf32, #tpu.memory_space<vmem>>, vector<1x1x32x32xf32>
    %54 = vector.shape_cast %53 : vector<1x1x32x32xf32> to vector<32x32xf32>
    %55 = arith.addf %54, %52 : vector<32x32xf32>
    %c0_51 = arith.constant 0 : index
    %c5_52 = arith.constant 5 : index
    %c0_53 = arith.constant 0 : index
    %c0_54 = arith.constant 0 : index
    %56 = vector.load %arg5[%c0_51, %c5_52, %c0_53, %c0_54] : memref<1x6x32x32xf32, #tpu.memory_space<vmem>>, vector<1x1x32x32xf32>
    %57 = vector.shape_cast %56 : vector<1x1x32x32xf32> to vector<32x32xf32>
    %58 = vector.shape_cast %55 : vector<32x32xf32> to vector<1x1x32x32xf32>
    tpu.vector_store %arg5[%c0_51, %c5_52, %c0_53, %c0_54], %58 {strides = array<i32>} : memref<1x6x32x32xf32, #tpu.memory_space<vmem>>, vector<1x1x32x32xf32>,
    return
  }
  func.func @transform_0(%arg0: i32) -> (i32, i32, i32) {
    %c0_i32 = arith.constant 0 : i32
    %c0_i32_0 = arith.constant 0 : i32
    %c0_i32_1 = arith.constant 0 : i32
    return %arg0, %c0_i32, %c0_i32_0 : i32, i32, i32
  }
  func.func @transform_1(%arg0: i32) -> (i32, i32, i32, i32) {
    %c0_i32 = arith.constant 0 : i32
    %c0_i32_0 = arith.constant 0 : i32
    %c0_i32_1 = arith.constant 0 : i32
    %c0_i32_2 = arith.constant 0 : i32
    return %arg0, %c0_i32, %c0_i32_0, %c0_i32_1 : i32, i32, i32, i32
  }
  func.func @transform_2(%arg0: i32) -> (i32, i32) {
    %c0_i32 = arith.constant 0 : i32
    %c0_i32_0 = arith.constant 0 : i32
    %c0_i32_1 = arith.constant 0 : i32
    return %c0_i32, %c0_i32_0 : i32, i32
  }
  func.func @transform_3(%arg0: i32) -> (i32, i32) {
    %c0_i32 = arith.constant 0 : i32
    %c0_i32_0 = arith.constant 0 : i32
    %c0_i32_1 = arith.constant 0 : i32
    return %c0_i32, %c0_i32_0 : i32, i32
  }
  func.func @transform_4(%arg0: i32) -> (i32, i32, i32, i32) {
    %c0_i32 = arith.constant 0 : i32
    %c0_i32_0 = arith.constant 0 : i32
    %c0_i32_1 = arith.constant 0 : i32
    %c0_i32_2 = arith.constant 0 : i32
    return %arg0, %c0_i32, %c0_i32_0, %c0_i32_1 : i32, i32, i32, i32
  }
}

</mosaic_0001>

<bundles_post_ra>
// kernel: lraspp_head.2
= control target key start
LH: loop header
LB: loop body
LE: loop exit
PB: predicated region body
PF: predicated region fallthrough
CT: control target
= control target key end

     0   :  { %s1123_s13 = smov 0   ;;  %s1266_s0 = inlined_call_operand.vmem [shape: f32[2,16,256], index: 0, kind: input, shape index: {}]   ;;  %s1267_s1 = inlined_call_operand.vmem [shape: f32[2,8,1024], index: 1, kind: input, shape index: {}]   ;;  %s1268_s2 = inlined_call_operand.vmem [shape: bf16[32,16], index: 2, kind: input, shape index: {}]   ;;  %s1269_s3 = inlined_call_operand.vmem [shape: f32[32,1], index: 3, kind: input, shape index: {}]   ;;  %s1270_s4 = inlined_call_operand.vmem [shape: f32[32,1], index: 4, kind: input, shape index: {}]   ;;  %s1271_s5 = inlined_call_operand.vmem [shape: f32[32,16], index: 5, kind: input, shape index: {}]   ;;  %s1272_s6 = inlined_call_operand.vmem [shape: bf16[6,32], index: 6, kind: input, shape index: {}]   ;;  %s1273_s7 = inlined_call_operand.vmem [shape: bf16[6,8], index: 7, kind: input, shape index: {}]   ;;  %s1274_s8 = inlined_call_operand.vmem [shape: f32[6,1], index: 8, kind: input, shape index: {}]   ;;  %s1275_s9 = inlined_call_operand.vmem [shape: bf16[2,6,256], index: 9, kind: output, shape index: {0}]   ;;  %s1276_s10 = inlined_call_operand.vmem [shape: f32[2,6,1024], index: 10, kind: output, shape index: {1}]  }
   0x1 LB: > { %s976_s14 = sadd.s32 4294967295, %s1064_s13   ;;  %p980_p0 = scmp.ge.s32.totalorder %s1064_s13, 1  ;;  %s1064_s13 = sphi %s1123_s13, %s21_s13  }
   0x2   : > { %p325_p1 = scmp.lt.s32.totalorder %s1064_s13, 3 }
   0x4   : > { %p326_p2 = pnand %p980_p0, %p325_p1 }
   0x5   : > { %p373_p3 = scmp.lt.s32.totalorder (!%p326_p2), %s976_s14, 1 }
   0x6   : > { %329 = sbr.rel (%p326_p2) target bundleno = 644 (0x284), region = 56 }
   0xb   : > { %s1278_s14 = smov (!%p373_p3, %s976_s14), 1  ;;  %v1066_v6 = vmov 256.0   ;;  %v1025_v17 = vld [vmem:[%s1268_s2] sm:$0xff]  ;;  %vm419_vm1 = vcmask 130048   ;;  %v416_v21 = vld [vmem:[%s1271_s5 + $0x8] sm:$0xff]  ;;  %v417_v23 = vld [vmem:[%s1271_s5 + $0x10] sm:$0xff] }
   0xc   : > { %s1021_s15 = sshll.u32 %s1278_s14, 5  ;;  %1040 = vrcp.f32 %v1066_v6  ;;  %v415_v20 = vld [vmem:[%s1271_s5] sm:$0xff]  ;;  %v1026_v22 = vld [vmem:[%s1268_s2 + $0x8] sm:$0xff]  ;;  %v418_v24 = vld [vmem:[%s1271_s5 + $0x18] sm:$0xff]  ;;  %s1022_s11 = sshll.u32 %s1278_s14, 6  ;;  %vm739_vm2 = vcmask 1043456  }
   0xd   : > { %s377_s18 = scalar_lea.vmem %s1266_s0, %s1021_s15  ;;  %s1161_s16 = scalar_lea.vmem %s1267_s1, %s1022_s11  ;;  %v1168_v28 = vld [vmem:[%s1273_s7] sm:$0x7]  ;;  %vm735_vm3 = vcmask 64512   ;;  %v1067_v40 = vmov 0  }
   0xe   : > { %v396_v0 = vld [vmem:[%s377_s18 + $0x10] sm:$0xff]  ;;  %v397_v1 = vld [vmem:[%s377_s18 + $0x18] sm:$0xff]  ;;  %v394_v3 = vld [vmem:[%s377_s18] sm:$0xff]  ;;  %1037 = vset.pattern.permute.xlu0 %v1067_v40  ;;  %1038 = vset.pattern.permute.xlu1 %v1067_v40  ;;  %s1228_s23 = scalar_lea.vmem %s1276_s10, %s1022_s11  ;;  %s1023_s25 = sshll.u32 %s1278_s14, 3 }
   0xf   : > { %v403_v2 = vadd.f32 %v397_v1, %v396_v0  ;;  %v395_v4 = vld [vmem:[%s377_s18 + $0x8] sm:$0xff]  ;;  %v398_v16 = vpack.c.bf16 %v396_v0, %v394_v3  ;;  %v715_v25 = vld [vmem:[%s1161_s16 + $0x10] sm:$0xff]  ;;  %v713_v29 = vld [vmem:[%s1161_s16] sm:$0xff]  ;;  %1039 = vset.pattern.permute.xlu2 %v1067_v40 }
  0x10   : > { %v400_v5 = vadd.f32 %v395_v4, %v394_v3  ;;  %v399_v15 = vpack.c.bf16 %v397_v1, %v395_v4  ;;  %v723_v26 = vpack.c.bf16 %v715_v25, %v715_v25  ;;  %v714_v30 = vld [vmem:[%s1161_s16 + $0x8] sm:$0xff]  ;;  %v721_v31 = vpack.c.bf16 %v713_v29, %v713_v29  ;;  %v719_v35 = vld [vmem:[%s1161_s16 + $0x30] sm:$0xff]  ;;  %v717_v38 = vld [vmem:[%s1161_s16 + $0x20] sm:$0xff] }
  0x11   : > { %404 = vadd.xlane.f32.xlu0 %v403_v2  ;;  %564 = vmatpush.bf16.msra.mxu1 %v398_v16  ;;  %v722_v32 = vpack.c.bf16 %v714_v30, %v714_v30  ;;  %v727_v36 = vpack.c.bf16 %v719_v35, %v719_v35  ;;  %v718_v39 = vld [vmem:[%s1161_s16 + $0x28] sm:$0xff]  ;;  %v725_v41 = vpack.c.bf16 %v717_v38, %v717_v38  ;;  %v595_v4 = vld [vmem:[%s1269_s3] sm:$0xff] }
  0x12   : > { %v1041_v7 = vpop.eup %1040  ;;  %583 = vmatpush.bf16.msra.mxu2 %v399_v15  ;;  %v747_v27 = vsel %vm739_vm2, %v723_v26, 0  ;;  %v741_v33 = vsel %vm739_vm2, %v721_v31, 0  ;;  %v726_v42 = vpack.c.bf16 %v718_v39, %v718_v39  ;;  %v597_v31 = vld [vmem:[%s1269_s3 + $0x10] sm:$0xff] }
  0x13   : > { %v407_v8 = vmul.f32 256.0, %v1041_v7  ;;  %vm411_vm0 = vweird.f32 %v1041_v7  ;;  %v744_v34 = vsel %vm739_vm2, %v722_v32, 0  ;;  %v759_v37 = vsel %vm739_vm2, %v727_v36, 0  ;;  %v633_v32 = vld [vmem:[%s1270_s4 + $0x10] sm:$0xff] }
  0x14   : > { %1005 = vmatmul.msk.bf16.vlgmr.msra.gmra.mxu1 %vm419_vm1, %v1025_v17  ;;  %v753_v44 = vsel %vm739_vm2, %v725_v41, 0  ;;  %v756_v45 = vsel %vm739_vm2, %v726_v42, 0 }
  0x15   : > { %v408_v9 = vsub.f32 1.0, %v407_v8  ;;  %1007 = vmatmul.msk.bf16.vlgmr.msra.gmra.mxu2 %vm419_vm1, %v1025_v17  ;;  %784 = vmatpush.bf16.msrb.mxu1 %v744_v34 }
  0x16   : > { %797 = vmatpush.bf16.msrb.mxu2 %v747_v27 }
  0x17   : > { %v409_v10 = vmul.f32 %v1041_v7, %v408_v9 }
  0x19   : > { %401 = vadd.xlane.f32.xlu0 %v400_v5  ;;  %v410_v11 = vadd.f32 %v1041_v7, %v409_v10  ;;  %836 = vmatpush.bf16.msra.mxu1 %v756_v45  ;;  %v598_v45 = vld [vmem:[%s1269_s3 + $0x18] sm:$0xff] }
  0x1a   : > { %849 = vmatpush.bf16.msra.mxu2 %v759_v37 }
  0x1b   : > { %v412_v12 = vsel %vm411_vm0, %v1041_v7, %v410_v11 }
  0x24   : > { %1006 = vmatmul.msk.bf16.gmra.mxu1 %vm419_vm1, %v1026_v22 }
  0x25   : > { %1008 = vmatmul.msk.bf16.gmra.mxu2 %vm419_vm1, %v1026_v22 }
  0x34   : > { %1012 = vmatmul.msk.bf16.vlgmr.msrb.gmra.mxu1 %vm735_vm3, %v1168_v28 }
  0x35   : > { %1013 = vmatmul.msk.bf16.vlgmr.msrb.gmra.mxu2 %vm735_vm3, %v1168_v28 }
  0x44   : > { %1016 = vmatmul.msk.bf16.vlgmr.msra.gmra.mxu1 %vm735_vm3, %v1168_v28 }
  0x45   : > { %1017 = vmatmul.msk.bf16.vlgmr.msra.gmra.mxu2 %vm735_vm3, %v1168_v28 }
  0x84   : > { %v405_v13 = vpop.xlane.xlu0 %404 }
  0x85   : > { %v414_v14 = vmul.f32 %v412_v12, %v405_v13 }
  0x87   : > { %446 = vmatpush.msra.mxu0 %v414_v14 }
  0x8c   : > { %v402_v18 = vpop.xlane.xlu0 %401 }
  0x8d   : > { %v413_v19 = vmul.f32 %v412_v12, %v402_v18  ;;  %v596_v18 = vld [vmem:[%s1269_s3 + $0x8] sm:$0xff] }
  0x8f   : > { %447 = vmatpush.msra.mxu0 %v413_v19 }
  0x90   : > { %989 = vmatmul.msk.f32.vlgmr.msra.gmra.mxu0 %vm419_vm1, %v415_v20 }
  0x91   : > { %771 = vmatpush.bf16.msrb.mxu0 %v741_v33 }
  0x95   : > { %823 = vmatpush.bf16.msra.mxu0 %v753_v44  ;;  %v634_v44 = vld [vmem:[%s1270_s4 + $0x18] sm:$0xff] }
  0x98   : > { %990 = vmatmul.msk.f32.gmra.mxu0 %vm419_vm1, %v416_v21 }
  0xa0   : > { %991 = vmatmul.msk.f32.gmra.mxu0 %vm419_vm1, %v417_v23 }
  0xa8   : > { %992 = vmatmul.msk.f32.gmra.mxu0 %vm419_vm1, %v418_v24 }
  0xb0   : > { %1011 = vmatmul.msk.bf16.vlgmr.msrb.gmra.mxu0 %vm735_vm3, %v1168_v28 }
  0xc0   : > { %1015 = vmatmul.msk.bf16.vlgmr.msra.gmra.mxu0 %vm735_vm3, %v1168_v28 }
 0x10d   : > { %v449_v43 = vpop.f32.mrf.mxu0 }
 0x10e   : > { %v993_v46 = vmul.f32 -1.442695, %v449_v43 }
 0x110   : > { %1042 = vpow2.f32 %v993_v46 }
 0x115   : > { %v452_v47 = vpop.f32.mrf.mxu0 }
 0x116   : > { %v1043_v48 = vpop.eup %1042  ;;  %v994_v49 = vmul.f32 -1.442695, %v452_v47 }
 0x117   : > { %v473_v50 = vadd.f32 1.0, %v1043_v48 }
 0x118   : > { %1044 = vpow2.f32 %v994_v49 }
 0x119   : > { %1046 = vrcp.f32 %v473_v50  ;;  %v488_v58 = vand.u32 2147483648, %v473_v50  ;;  %v486_v60 = vand.u32 2147483647, %v473_v50  ;;  %vm482_vm5 = vweird.f32 %v473_v50 }
 0x11b   : > { %v489_v3 = vor.u32 1.1754944e-38, %v488_v58  ;;  %vm487_vm7 = vcmp.eq.f32.partialorder %v486_v60, 8.507059e+37 }
 0x11d   : > { %v455_v51 = vpop.f32.mrf.mxu0 }
 0x11e   : > { %v1045_v52 = vpop.eup %1044  ;;  %v995_v53 = vmul.f32 -1.442695, %v455_v51  ;;  %v631_v51 = vld [vmem:[%s1270_s4] sm:$0xff] }
 0x11f   : > { %v1047_v54 = vpop.eup %1046  ;;  %v474_v55 = vadd.f32 1.0, %v1045_v52 }
 0x120   : > { %v478_v56 = vmul.f32 %v1047_v54, %v473_v50  ;;  %1048 = vpow2.f32 %v995_v53  ;;  %vm483_vm4 = vweird.f32 %v1047_v54  ;;  %v632_v50 = vld [vmem:[%s1270_s4 + $0x8] sm:$0xff] }
 0x121   : > { %1050 = vrcp.f32 %v474_v55  ;;  %vm484_vm6 = vmor %vm482_vm5, %vm483_vm4  ;;  %v503_v10 = vand.u32 2147483648, %v474_v55  ;;  %v501_v12 = vand.u32 2147483647, %v474_v55  ;;  %vm497_vm9 = vweird.f32 %v474_v55 }
 0x122   : > { %v479_v57 = vsub.f32 1.0, %v478_v56  ;;  %v566_v56 = vpop.f32.mrf.mxu1 }
 0x123   : > { %v504_v17 = vor.u32 1.1754944e-38, %v503_v10  ;;  %vm502_vm11 = vcmp.eq.f32.partialorder %v501_v12, 8.507059e+37 }
 0x124   : > { %v480_v59 = vmul.f32 %v1047_v54, %v479_v57 }
 0x125   : > { %v458_v61 = vpop.f32.mrf.mxu0 }
 0x126   : > { %v1049_v62 = vpop.eup %1048  ;;  %v996_v63 = vmul.f32 -1.442695, %v458_v61  ;;  %v481_v0 = vadd.f32 %v1047_v54, %v480_v59 }
 0x127   : > { %v1051_v1 = vpop.eup %1050  ;;  %v475_v2 = vadd.f32 1.0, %v1049_v62 }
 0x128   : > { %1052 = vpow2.f32 %v996_v63  ;;  %v485_v5 = vsel %vm484_vm6, %v1047_v54, %v481_v0  ;;  %v493_v6 = vmul.f32 %v1051_v1, %v474_v55  ;;  %vm498_vm8 = vweird.f32 %v1051_v1  ;;  %v729_v54 = vld [vmem:[%s1274_s8] sm:$0x3f]  ;;  %v585_v55 = vpop.f32.mrf.mxu2 }
 0x129   : > { %1054 = vrcp.f32 %v475_v2  ;;  %v1195_v7 = vsel %vm487_vm7, %v489_v3, %v485_v5  ;;  %vm499_vm10 = vmor %vm497_vm9, %vm498_vm8  ;;  %v518_v24 = vand.u32 2147483648, %v475_v2  ;;  %v516_v26 = vand.u32 2147483647, %v475_v2 }
 0x12a   : > { %v599_v8 = vmul.f32 %v595_v4, %v1195_v7  ;;  %v494_v9 = vsub.f32 1.0, %v493_v6  ;;  %vm512_vm13 = vweird.f32 %v475_v2  ;;  %v635_v53 = vmul.f32 %v631_v51, %v1195_v7  ;;  %v568_v58 = vpop.f32.mrf.mxu1 }
 0x12b   : > { %v519_v30 = vor.u32 1.1754944e-38, %v518_v24  ;;  %vm517_vm15 = vcmp.eq.f32.partialorder %v516_v26, 8.507059e+37  ;;  %vm680_vm6 = vcmask 261120  }
 0x12c   : > { %605 = vperm.xlu0 %1037, %v599_v8   ;;  %v495_v11 = vmul.f32 %v1051_v1, %v494_v9 }
 0x12d   : > { %v773_v0 = vpop.f32.mrf.mxu0 }
 0x12e   : > { %v1053_v13 = vpop.eup %1052  ;;  %v496_v14 = vadd.f32 %v1051_v1, %v495_v11 }
 0x12f   : > { %v1055_v15 = vpop.eup %1054  ;;  %v476_v16 = vadd.f32 1.0, %v1053_v13 }
 0x130   : > { %v500_v19 = vsel %vm499_vm10, %v1051_v1, %v496_v14  ;;  %v508_v20 = vmul.f32 %v1055_v15, %v475_v2  ;;  %vm513_vm12 = vweird.f32 %v1055_v15  ;;  %v587_v57 = vpop.f32.mrf.mxu2 }
 0x131   : > { %1056 = vrcp.f32 %v476_v16  ;;  %v505_v21 = vsel %vm502_vm11, %v504_v17, %v500_v19  ;;  %vm514_vm14 = vmor %vm512_vm13, %vm513_vm12  ;;  %v533_v39 = vand.u32 2147483648, %v476_v16  ;;  %v531_v41 = vand.u32 2147483647, %v476_v16 }
 0x132   : > { %v600_v22 = vmul.f32 %v596_v18, %v505_v21  ;;  %v509_v23 = vsub.f32 1.0, %v508_v20  ;;  %vm527_vm1 = vweird.f32 %v476_v16  ;;  %v636_v52 = vmul.f32 %v632_v50, %v505_v21  ;;  %v571_v60 = vpop.f32.mrf.mxu1 }
 0x133   : > { %v534_v43 = vor.u32 1.1754944e-38, %v533_v39  ;;  %vm532_vm5 = vcmp.eq.f32.partialorder %v531_v41, 8.507059e+37 }
 0x134   : > { %610 = vperm.xlu1 %1038, %v600_v22   ;;  %v510_v25 = vmul.f32 %v1055_v15, %v509_v23 }
 0x135   : > { %v775_v3 = vpop.f32.mrf.mxu0 }
 0x136   : > { %v511_v27 = vadd.f32 %v1055_v15, %v510_v25 }
 0x137   : > { %v1057_v29 = vpop.eup %1056 }
 0x138   : > { %v523_v33 = vmul.f32 %v1057_v29, %v476_v16  ;;  %v515_v34 = vsel %vm514_vm14, %v1055_v15, %v511_v27  ;;  %vm528_vm0 = vweird.f32 %v1057_v29  ;;  %v590_v59 = vpop.f32.mrf.mxu2 }
 0x139   : > { %v520_v35 = vsel %vm517_vm15, %v519_v30, %v515_v34  ;;  %vm529_vm4 = vmor %vm527_vm1, %vm528_vm0 }
 0x13a   : > { %v637_v36 = vmul.f32 %v633_v32, %v520_v35  ;;  %v601_v37 = vmul.f32 %v597_v31, %v520_v35  ;;  %v524_v38 = vsub.f32 1.0, %v523_v33  ;;  %v573_v62 = vpop.f32.mrf.mxu1 }
 0x13c   : > { %651 = vperm.xlu2 %1039, %v637_v36   ;;  %615 = vperm.xlu1 %1038, %v601_v37   ;;  %v525_v40 = vmul.f32 %v1057_v29, %v524_v38 }
 0x13d   : > { %v825_v6 = vpop.f32.mrf.mxu0 }
 0x13e   : > { %v526_v42 = vadd.f32 %v1057_v29, %v525_v40 }
 0x140   : > { %v530_v46 = vsel %vm529_vm4, %v1057_v29, %v526_v42  ;;  %v592_v61 = vpop.f32.mrf.mxu2 }
 0x141   : > { %v535_v47 = vsel %vm532_vm5, %v534_v43, %v530_v46 }
 0x142   : > { %v638_v48 = vmul.f32 %v634_v44, %v535_v47  ;;  %v602_v49 = vmul.f32 %v598_v45, %v535_v47  ;;  %v786_v1 = vpop.f32.mrf.mxu1 }
 0x144   : > { %656 = vperm.xlu2 %1039, %v638_v48   ;;  %620 = vperm.xlu1 %1038, %v602_v49   ;;  %v716_v48 = vld [vmem:[%s1161_s16 + $0x18] sm:$0xff] }
 0x145   : > { %v827_v10 = vpop.f32.mrf.mxu0 }
 0x148   : > { %v799_v63 = vpop.f32.mrf.mxu2 }
 0x14a   : > { %v788_v4 = vpop.f32.mrf.mxu1 }
 0x14c   : > { %641 = vperm.xlu2 %1039, %v635_v53   ;;  %646 = vperm.xlu1 %1038, %v636_v52  }
 0x150   : > { %v801_v2 = vpop.f32.mrf.mxu2 }
 0x152   : > { %v838_v7 = vpop.f32.mrf.mxu1 }
 0x154   : > { %732 = vperm.xlu2 %1039, %v729_v54   ;;  %v724_v54 = vpack.c.bf16 %v716_v48, %v716_v48 }
 0x158   : > { %v851_v5 = vpop.f32.mrf.mxu2 }
 0x15a   : > { %v840_v11 = vpop.f32.mrf.mxu1 }
 0x160   : > { %v853_v9 = vpop.f32.mrf.mxu2 }
 0x196   : > { %v652_v8 = vpop.permute.xlu2 %651 }
 0x19e   : > { %v657_v12 = vpop.permute.xlu2 %656  ;;  %v606_v27 = vpop.permute.xlu0 %605 }
 0x19f   : > { %v623_v32 = vmul.f32 %v606_v27, %v566_v56  ;;  %v624_v43 = vmul.f32 %v606_v27, %v585_v55  ;;  %v675_v56 = vld [vmem:[%s1272_s6] sm:$0x7] }
 0x1a6   : > { %v611_v13 = vpop.permute.xlu1 %610  ;;  %v642_v14 = vpop.permute.xlu2 %641 }
 0x1a7   : > { %v625_v36 = vmul.f32 %v611_v13, %v568_v58  ;;  %v659_v37 = vadd.f32 %v642_v14, %v623_v32  ;;  %v626_v39 = vmul.f32 %v611_v13, %v587_v57  ;;  %v660_v49 = vadd.f32 %v642_v14, %v624_v43 }
 0x1a8   : > { %v750_v58 = vsel %vm739_vm2, %v724_v54, 0 }
 0x1a9   : > { %v667_v46 = vmax.f32 %v659_v37, 0.0  ;;  %v668_v57 = vmax.f32 %v660_v49, 0.0 }
 0x1ae   : > { %v616_v15 = vpop.permute.xlu1 %615  ;;  %v1230_v16 = vpop.permute.xlu2 %732 }
 0x1af   : > { %v774_v17 = vadd.f32 %v773_v0, %v1230_v16  ;;  %v787_v18 = vadd.f32 %v786_v1, %v1230_v16  ;;  %v800_v19 = vadd.f32 %v799_v63, %v1230_v16  ;;  %v826_v20 = vadd.f32 %v825_v6, %v1230_v16 }
 0x1b0   : > { %v852_v21 = vadd.f32 %v851_v5, %v1230_v16  ;;  %v839_v22 = vadd.f32 %v838_v7, %v1230_v16  ;;  %v627_v23 = vmul.f32 %v616_v15, %v571_v60  ;;  %v628_v31 = vmul.f32 %v616_v15, %v590_v59  ;;  %v720_v59 = vld [vmem:[%s1161_s16 + $0x38] sm:$0xff]  ;;  %s387_s16 = scalar_lea.vmem %s1275_s9, %s1023_s25 }
 0x1b1   : > { %868 = vst [vmem:[%s1228_s23] sm:$0x3f] %v774_v17  ;;  %v728_v60 = vpack.c.bf16 %v720_v59, %v720_v59 }
 0x1b2   : > { %869 = vst [vmem:[%s1228_s23 + $0x8] sm:$0x3f] %v787_v18  ;;  %v663_v26 = vadd.f32 %v652_v8, %v627_v23  ;;  %v664_v40 = vadd.f32 %v652_v8, %v628_v31 }
 0x1b3   : > { %870 = vst [vmem:[%s1228_s23 + $0x10] sm:$0x3f] %v800_v19 }
 0x1b4   : > { %872 = vst [vmem:[%s1228_s23 + $0x20] sm:$0x3f] %v826_v20  ;;  %v671_v33 = vmax.f32 %v663_v26, 0.0  ;;  %v672_v50 = vmax.f32 %v664_v40, 0.0 }
 0x1b5   : > { %874 = vst [vmem:[%s1228_s23 + $0x30] sm:$0x3f] %v852_v21 }
 0x1b6   : > { %873 = vst [vmem:[%s1228_s23 + $0x28] sm:$0x3f] %v839_v22  ;;  %v621_v24 = vpop.permute.xlu1 %620 }
 0x1b7   : > { %v629_v25 = vmul.f32 %v621_v24, %v573_v62  ;;  %v630_v29 = vmul.f32 %v621_v24, %v592_v61  ;;  %v762_v61 = vsel %vm739_vm2, %v728_v60, 0 }
 0x1b9   : > { %v665_v30 = vadd.f32 %v657_v12, %v629_v25  ;;  %v666_v35 = vadd.f32 %v657_v12, %v630_v29 }
 0x1bb   : > { %v673_v34 = vmax.f32 %v665_v30, 0.0  ;;  %v674_v45 = vmax.f32 %v666_v35, 0.0 }
 0x1bd   : > { %v678_v38 = vpack.c.bf16 %v673_v34, %v671_v33  ;;  %v679_v53 = vpack.c.bf16 %v674_v45, %v672_v50 }
 0x1be   : > { %v647_v41 = vpop.permute.xlu1 %646 }
 0x1bf   : > { %v661_v42 = vadd.f32 %v647_v41, %v625_v36  ;;  %690 = vmatpush.bf16.msra.mxu3 %v678_v38  ;;  %v662_v44 = vadd.f32 %v647_v41, %v626_v39 }
 0x1c1   : > { %v669_v47 = vmax.f32 %v661_v42, 0.0  ;;  %v670_v52 = vmax.f32 %v662_v44, 0.0 }
 0x1c3   : > { %v676_v51 = vpack.c.bf16 %v669_v47, %v667_v46  ;;  %v677_v55 = vpack.c.bf16 %v670_v52, %v668_v57 }
 0x1c5   : > { %691 = vmatpush.bf16.msra.mxu3 %v676_v51 }
 0x1c8   : > { %1009 = vmatmul.msk.bf16.vlgmr.msra.gmra.mxu3 %vm680_vm6, %v675_v56 }
 0x1c9   : > { %703 = vmatpush.bf16.msrb.mxu3 %v679_v53 }
 0x1cd   : > { %704 = vmatpush.bf16.msrb.mxu3 %v677_v55 }
 0x1d1   : > { %810 = vmatpush.bf16.msra.mxu3 %v750_v58 }
 0x1d8   : > { %1010 = vmatmul.msk.bf16.vlgmr.msrb.gmra.mxu3 %vm680_vm6, %v675_v56 }
 0x1d9   : > { %862 = vmatpush.bf16.msrb.mxu3 %v762_v61 }
 0x1e8   : > { %1014 = vmatmul.msk.bf16.vlgmr.msra.gmra.mxu3 %vm735_vm3, %v1168_v28 }
 0x1f8   : > { %1018 = vmatmul.msk.bf16.vlgmr.msrb.gmra.mxu3 %vm735_vm3, %v1168_v28 }
 0x24b   : > { %v693_v62 = vpop.f32.mrf.mxu3 }
 0x253   : > { %v695_v63 = vpop.f32.mrf.mxu3 }
 0x25b   : > { %v706_v0 = vpop.f32.mrf.mxu3 }
 0x25c   : > { %v710_v1 = vpack.c.bf16 %v706_v0, %v693_v62 }
 0x25e   : > { %711 = vst [vmem:[%s387_s16] sm:$0x77] %v710_v1 }
 0x263   : > { %v708_v2 = vpop.f32.mrf.mxu3 }
 0x26b   : > { %v812_v3 = vpop.f32.mrf.mxu3 }
 0x26c   : > { %v813_v4 = vadd.f32 %v812_v3, %v1230_v16 }
 0x26e   : > { %871 = vst [vmem:[%s1228_s23 + $0x18] sm:$0x3f] %v813_v4 }
 0x273   : > { %v814_v5 = vpop.f32.mrf.mxu3 }
 0x27b   : > { %v864_v6 = vpop.f32.mrf.mxu3 }
 0x27c   : > { %v865_v7 = vadd.f32 %v864_v6, %v1230_v16 }
 0x27e   : > { %875 = vst [vmem:[%s1228_s23 + $0x38] sm:$0x3f] %v865_v7 }
 0x283   : > { %v866_v28 = vpop.f32.mrf.mxu3 }
 0x284 PF: > { %s21_s13 = sadd.s32 1, %s1064_s13  }
 0x285   : > { %p18_p4 = scmp.ge.s32.totalorder %s21_s13, 4  }
 0x287   :  { %20 = sbr.rel (!%p18_p4) target bundleno = 1 (0x1), region = 101 }

// kernel: lraspp_head.3
= control target key start
LH: loop header
LB: loop body
LE: loop exit
PB: predicated region body
PF: predicated region fallthrough
CT: control target
= control target key end

     0   :  { %9 = vsyncpa [#allocation3], 0  ;;  %s1087_s0 = inlined_call_operand.vmem [shape: bf16[2,96,16], index: 0, kind: input, shape index: {}]   ;;  %s1088_s1 = inlined_call_operand.vmem [shape: f32[2,6,32,32], index: 1, kind: input, shape index: {}]   ;;  %s1089_s2 = inlined_call_operand.vmem [shape: bf16[32,16], index: 2, kind: input, shape index: {}]   ;;  %s1090_s3 = inlined_call_operand.vmem [shape: bf16[16,32], index: 3, kind: input, shape index: {}]   ;;  %s1091_s4 = inlined_call_operand.hbm [shape: f32[2,6,32,32], index: 4, kind: output, shape index: {}]  }
   0x1   :  { %11 = vsyncpa [#allocation3 + $0x1], 0  ;;  %s887_s15 = smov 0   ;;  %s889_s16 = smov 0  }
   0x2   :  { %s891_s17 = smov 0   ;;  %s893_s18 = smov 0  }
   0x3 LB: > { %s908_s19 = sadd.s32 4294967295, %s858_s18   ;;  %s638_s20 = sadd.s32 4294967294, %s858_s18   ;;  %s858_s18 = sphi %s893_s18, %s1097_s18   ;;  %s854_s17 = sphi %s891_s17, %s1096_s17   ;;  %s850_s16 = sphi %s889_s16, %s1095_s16   ;;  %s846_s15 = sphi %s887_s15, %s1094_s15  }
   0x4   : > { %s912_s21 = sadd.s32 1, %s858_s18   ;;  %s118_s22 = sadd.s32 1, %s854_s17 }
   0x5   : > { %s115_s23 = ssub.s32 %s858_s18, %s912_s21  ;;  %p128_p0 = scmp.ne.s32.totalorder %s854_s17, %s850_s16 }
   0x6   : > { %p116_p1 = scmp.eq.s32.totalorder %s115_s23, 0  ;;  %p129_p2 = scmp.eq.s32.totalorder %s908_s19, 1 }
   0x7   : > { %p134_p3 = scmp.ne.s32.totalorder %s850_s16, %s846_s15  ;;  %p135_p4 = scmp.eq.s32.totalorder %s638_s20, 1 }
   0x8   : > { %s923_s24 = scalar_select %p116_p1, %s854_s17, %s118_s22  }
   0x9   : > { %p925_p5 = por %p129_p2, %p128_p0  ;;  %p929_p6 = por %p135_p4, %p134_p3 }
   0xa   : > { %p641_p7 = scmp.ge.s32.totalorder %s858_s18, 1  ;;  %p175_p8 = scmp.lt.s32.totalorder %s858_s18, 3 }
   0xc   : > { %p176_p9 = pnand %p641_p7, %p175_p8 }
   0xd   : > { %p206_p10 = scmp.lt.s32.totalorder (!%p176_p9), %s908_s19, 1  ;;  %s203_s13 = sand.u32 (!%p176_p9), 1, %s850_s16  }
   0xe   : > { %179 = sbr.rel (%p176_p9) target bundleno = 391 (0x187), region = 36 }
   0xf   : > { %s751_s23 = smul.u32 (!%p176_p9), 192, %s203_s13 }
  0x10   : > { %s754_s28 = smul.u32 (!%p176_p9), 192, %s908_s19 }
  0x11   : > { %s980_s27 = scalar_lea.vmem (!%p176_p9), [#allocation2], %s751_s23 }
  0x12   : > { %s560_s5 = scalar_lea.hbm (!%p176_p9), %s1091_s4, %s754_s28  ;;  %s561_s6 = sshll.u32 (!%p176_p9), %s980_s27, 4  ;;  %s562_s6 = int_to_ptr.vmem [resolvable:$true] %s561_s6 }
  0x13   : > { %v747_v0 = vld [vmem:[%s1090_s3] sm:$0xff]  ;;  %s940_s29 = scalar_select %p206_p10, %s908_s19, 1  ;;  %vm267_vm0 = vcmask 130048   ;;  %v749_v15 = vld [vmem:[%s1089_s2 + $0x8] sm:$0xff]  ;;  %vm373_vm1 = vcmask 261120  }
  0x14   : > { %293 = vmatpush.bf16.msra.mxu0 %v747_v0  ;;  %750 = vmatpush.bf16.msra.mxu1 %v747_v0  ;;  %v748_v10 = vld [vmem:[%s1089_s2] sm:$0xff]  ;;  %s563_s19 = sshll.u32 %s560_s5, 4  ;;  %s564_s19 = int_to_ptr.hbm [resolvable:$true] %s563_s19 }
  0x15   : > { %s752_s30 = smul.u32 48, %s940_s29  ;;  %s810_s8 = sshra.s32 %s564_s19, 4  ;;  %s811_s8 = int_to_ptr.hbm [resolvable:$true] %s810_s8 }
  0x16   : > { %s753_s12 = smul.u32 192, %s940_s29  ;;  %s812_s9 = scalar_lea.hbm %s811_s8, 192 }
  0x17   : > { %s210_s7 = scalar_lea.vmem %s1087_s0, %s752_s30  ;;  %p813_p11 = scmp.ne.s32.totalorder %s811_s8, %s812_s9 }
  0x18   : > { %v741_v1 = vld [vmem:[%s210_s7] sm:$0xff]  ;;  %v742_v2 = vld [vmem:[%s210_s7 + $0x8] sm:$0xff]  ;;  %v743_v4 = vld [vmem:[%s210_s7 + $0x10] sm:$0xff]  ;;  %s975_s22 = scalar_lea.vmem %s1088_s1, %s753_s12  ;;  %s816_s12 = scalar_lea.hbm %s1091_s4, 384 }
  0x19   : > { %672 = vmatmul.msk.bf16.vlgmr.msra.gmra.mxu0 %vm267_vm0, %v741_v1  ;;  %v746_v3 = vld [vmem:[%s210_s7 + $0x28] sm:$0xff]  ;;  %v744_v5 = vld [vmem:[%s210_s7 + $0x18] sm:$0xff]  ;;  %v745_v6 = vld [vmem:[%s210_s7 + $0x20] sm:$0xff]  ;;  %s549_s7 = scalar_lea.sflag [#allocation3], %s203_s13  ;;  %p814_p12 = pnand %p813_p11, %p925_p5 }
  0x1a   : > { %677 = vmatmul.msk.bf16.vlgmr.msra.gmra.mxu1 %vm267_vm0, %v746_v3  ;;  %v365_v27 = vld [vmem:[%s975_s22] sm:$0xff]  ;;  %v366_v30 = vld [vmem:[%s975_s22 + $0x8] sm:$0xff]  ;;  %v367_v34 = vld [vmem:[%s975_s22 + $0x10] sm:$0xff]  ;;  %p817_p0 = scmp.lt.s32.totalorder %s811_s8, %s1091_s4  ;;  %p818_p1 = scmp.lt.s32.totalorder %s816_s12, %s812_s9 }
  0x1b   : > { %v690_v36 = vld [vmem:[%s975_s22 + $0x20] sm:$0xff]  ;;  %v368_v38 = vld [vmem:[%s975_s22 + $0x18] sm:$0xff]  ;;  %v691_v42 = vld [vmem:[%s975_s22 + $0x28] sm:$0xff]  ;;  %p815_p13 = pneg %p814_p12 }
  0x1c   : > { %v700_v45 = vld [vmem:[%s975_s22 + $0x40] sm:$0xff]  ;;  %v692_v46 = vld [vmem:[%s975_s22 + $0x30] sm:$0xff]  ;;  %v701_v51 = vld [vmem:[%s975_s22 + $0x48] sm:$0xff]  ;;  %p819_p2 = por %p818_p1, %p817_p0 }
  0x1d   : > { %v693_v52 = vld [vmem:[%s975_s22 + $0x38] sm:$0xff]  ;;  %v710_v55 = vld [vmem:[%s975_s22 + $0x60] sm:$0xff]  ;;  %v702_v60 = vld [vmem:[%s975_s22 + $0x50] sm:$0xff] }
  0x1e   : > { %v711_v62 = vld [vmem:[%s975_s22 + $0x68] sm:$0xff]  ;;  %p820_p3 = pnand %p819_p2, %p815_p13 }
  0x29   : > { %673 = vmatmul.msk.bf16.gmra.mxu0 %vm267_vm0, %v742_v2  ;;  %v703_v2 = vld [vmem:[%s975_s22 + $0x58] sm:$0xff] }
  0x39   : > { %674 = vmatmul.msk.bf16.gmra.mxu0 %vm267_vm0, %v743_v4 }
  0x49   : > { %675 = vmatmul.msk.bf16.gmra.mxu0 %vm267_vm0, %v744_v5  ;;  %v712_v5 = vld [vmem:[%s975_s22 + $0x70] sm:$0xff] }
  0x59   : > { %676 = vmatmul.msk.bf16.gmra.mxu0 %vm267_vm0, %v745_v6 }
  0x96   : > { %v295_v7 = vpop.f32.mrf.mxu0 }
  0x97   : > { %v320_v14 = vpop.f32.mrf.mxu1 }
  0x9e   : > { %v297_v8 = vpop.f32.mrf.mxu0 }
  0x9f   : > { %v329_v9 = vpack.c.bf16 %v297_v8, %v295_v7  ;;  %v322_v17 = vpop.f32.mrf.mxu1  ;;  %v720_v8 = vld [vmem:[%s975_s22 + $0x80] sm:$0xff] }
  0xa0   : > { %v514_v19 = vpack.c.bf16 %v322_v17, %v320_v14  ;;  %v713_v14 = vld [vmem:[%s975_s22 + $0x78] sm:$0xff]  ;;  %v721_v17 = vld [vmem:[%s975_s22 + $0x88] sm:$0xff] }
  0xa1   : > { %353 = vmatpush.bf16.msrb.mxu1 %v329_v9  ;;  %v730_v9 = vld [vmem:[%s975_s22 + $0xa0] sm:$0xff] }
  0xa4   : > { %686 = vmatmul.msk.bf16.vlgmr.msrb.gmra.mxu1 %vm267_vm0, %v748_v10 }
  0xa6   : > { %v300_v11 = vpop.f32.mrf.mxu0 }
  0xae   : > { %v302_v12 = vpop.f32.mrf.mxu0 }
  0xaf   : > { %v378_v13 = vpack.c.bf16 %v302_v12, %v300_v11 }
  0xb1   : > { %386 = vmatpush.bf16.msra.mxu2 %v378_v13 }
  0xb4   : > { %688 = vmatmul.msk.bf16.vlgmr.msra.gmra.mxu2 %vm267_vm0, %v748_v10  ;;  %687 = vmatmul.msk.bf16.gmra.mxu1 %vm267_vm0, %v749_v15 }
  0xb6   : > { %v305_v16 = vpop.f32.mrf.mxu0 }
  0xbe   : > { %v307_v18 = vpop.f32.mrf.mxu0 }
  0xbf   : > { %v412_v20 = vpack.c.bf16 %v307_v18, %v305_v16  ;;  %v731_v18 = vld [vmem:[%s975_s22 + $0xa8] sm:$0xff] }
  0xc1   : > { %420 = vmatpush.bf16.msra.mxu3 %v412_v20 }
  0xc4   : > { %698 = vmatmul.msk.bf16.vlgmr.msra.gmra.mxu3 %vm267_vm0, %v748_v10  ;;  %689 = vmatmul.msk.bf16.gmra.mxu2 %vm267_vm0, %v749_v15 }
  0xc5   : > { %522 = vmatpush.bf16.msrb.mxu3 %v514_v19 }
  0xc6   : > { %v310_v21 = vpop.f32.mrf.mxu0 }
  0xce   : > { %v312_v22 = vpop.f32.mrf.mxu0 }
  0xcf   : > { %v446_v23 = vpack.c.bf16 %v312_v22, %v310_v21 }
  0xd1   : > { %454 = vmatpush.bf16.msra.mxu1 %v446_v23  ;;  %v722_v23 = vld [vmem:[%s975_s22 + $0x90] sm:$0xff] }
  0xd4   : > { %699 = vmatmul.msk.bf16.gmra.mxu3 %vm267_vm0, %v749_v15  ;;  %708 = vmatmul.msk.bf16.vlgmr.msra.gmra.mxu1 %vm267_vm0, %v748_v10 }
  0xd6   : > { %v315_v24 = vpop.f32.mrf.mxu0 }
  0xde   : > { %v317_v25 = vpop.f32.mrf.mxu0 }
  0xdf   : > { %v480_v26 = vpack.c.bf16 %v317_v25, %v315_v24  ;;  %v732_v24 = vld [vmem:[%s975_s22 + $0xb0] sm:$0xff] }
  0xe1   : > { %488 = vmatpush.bf16.msrb.mxu2 %v480_v26 }
  0xe4   : > { %718 = vmatmul.msk.bf16.vlgmr.msrb.gmra.mxu2 %vm267_vm0, %v748_v10  ;;  %728 = vmatmul.msk.bf16.vlgmr.msrb.gmra.mxu3 %vm267_vm0, %v748_v10 }
  0xe5   : > { %709 = vmatmul.msk.bf16.gmra.mxu1 %vm267_vm0, %v749_v15 }
  0xf4   : > { %719 = vmatmul.msk.bf16.gmra.mxu2 %vm267_vm0, %v749_v15  ;;  %729 = vmatmul.msk.bf16.gmra.mxu3 %vm267_vm0, %v749_v15 }
 0x121   : > { %v355_v28 = vpop.f32.mrf.mxu1 }
 0x122   : > { %v369_v29 = vadd.f32 %v365_v27, %v355_v28 }
 0x124   : > { %374 = vst.msk [vmem:[%s980_s27] sm:$0xff] %vm373_vm1, %v369_v29  ;;  %v723_v29 = vld [vmem:[%s975_s22 + $0x98] sm:$0xff] }
 0x129   : > { %v357_v31 = vpop.f32.mrf.mxu1 }
 0x12a   : > { %v370_v32 = vadd.f32 %v366_v30, %v357_v31  ;;  %v733_v30 = vld [vmem:[%s975_s22 + $0xb8] sm:$0xff] }
 0x12c   : > { %375 = vst.msk [vmem:[%s980_s27 + $0x8] sm:$0xff] %vm373_vm1, %v370_v32 }
 0x131   : > { %v360_v33 = vpop.f32.mrf.mxu1 }
 0x132   : > { %v371_v35 = vadd.f32 %v367_v34, %v360_v33 }
 0x134   : > { %376 = vst.msk [vmem:[%s980_s27 + $0x10] sm:$0xff] %vm373_vm1, %v371_v35 }
 0x137   : > { %v388_v37 = vpop.f32.mrf.mxu2 }
 0x138   : > { %v403_v39 = vadd.f32 %v690_v36, %v388_v37 }
 0x139   : > { %v362_v40 = vpop.f32.mrf.mxu1 }
 0x13a   : > { %694 = vst.msk [vmem:[%s980_s27 + $0x20] sm:$0xff] %vm373_vm1, %v403_v39  ;;  %v372_v41 = vadd.f32 %v368_v38, %v362_v40 }
 0x13c   : > { %377 = vst.msk [vmem:[%s980_s27 + $0x18] sm:$0xff] %vm373_vm1, %v372_v41 }
 0x13f   : > { %v390_v43 = vpop.f32.mrf.mxu2 }
 0x140   : > { %v404_v44 = vadd.f32 %v691_v42, %v390_v43 }
 0x142   : > { %695 = vst.msk [vmem:[%s980_s27 + $0x28] sm:$0xff] %vm373_vm1, %v404_v44 }
 0x147   : > { %v422_v47 = vpop.f32.mrf.mxu3  ;;  %v393_v48 = vpop.f32.mrf.mxu2 }
 0x148   : > { %v437_v49 = vadd.f32 %v700_v45, %v422_v47  ;;  %v405_v50 = vadd.f32 %v692_v46, %v393_v48 }
 0x14a   : > { %704 = vst.msk [vmem:[%s980_s27 + $0x40] sm:$0xff] %vm373_vm1, %v437_v49 }
 0x14b   : > { %696 = vst.msk [vmem:[%s980_s27 + $0x30] sm:$0xff] %vm373_vm1, %v405_v50 }
 0x14f   : > { %v424_v53 = vpop.f32.mrf.mxu3  ;;  %v395_v54 = vpop.f32.mrf.mxu2 }
 0x150   : > { %v438_v56 = vadd.f32 %v701_v51, %v424_v53  ;;  %v406_v57 = vadd.f32 %v693_v52, %v395_v54 }
 0x151   : > { %v456_v58 = vpop.f32.mrf.mxu1 }
 0x152   : > { %705 = vst.msk [vmem:[%s980_s27 + $0x48] sm:$0xff] %vm373_vm1, %v438_v56  ;;  %v471_v59 = vadd.f32 %v710_v55, %v456_v58 }
 0x153   : > { %697 = vst.msk [vmem:[%s980_s27 + $0x38] sm:$0xff] %vm373_vm1, %v406_v57 }
 0x154   : > { %714 = vst.msk [vmem:[%s980_s27 + $0x60] sm:$0xff] %vm373_vm1, %v471_v59 }
 0x157   : > { %v427_v61 = vpop.f32.mrf.mxu3 }
 0x158   : > { %v439_v63 = vadd.f32 %v702_v60, %v427_v61 }
 0x159   : > { %v458_v0 = vpop.f32.mrf.mxu1 }
 0x15a   : > { %706 = vst.msk [vmem:[%s980_s27 + $0x50] sm:$0xff] %vm373_vm1, %v439_v63  ;;  %v472_v1 = vadd.f32 %v711_v62, %v458_v0 }
 0x15c   : > { %715 = vst.msk [vmem:[%s980_s27 + $0x68] sm:$0xff] %vm373_vm1, %v472_v1 }
 0x15f   : > { %v429_v3 = vpop.f32.mrf.mxu3 }
 0x160   : > { %v440_v4 = vadd.f32 %v703_v2, %v429_v3 }
 0x162   : > { %707 = vst.msk [vmem:[%s980_s27 + $0x58] sm:$0xff] %vm373_vm1, %v440_v4  ;;  %v461_v6 = vpop.f32.mrf.mxu1 }
 0x163   : > { %v473_v7 = vadd.f32 %v712_v5, %v461_v6 }
 0x165   : > { %716 = vst.msk [vmem:[%s980_s27 + $0x70] sm:$0xff] %vm373_vm1, %v473_v7 }
 0x167   : > { %v490_v10 = vpop.f32.mrf.mxu2  ;;  %v524_v11 = vpop.f32.mrf.mxu3 }
 0x168   : > { %v505_v12 = vadd.f32 %v720_v8, %v490_v10  ;;  %v539_v13 = vadd.f32 %v730_v9, %v524_v11 }
 0x16a   : > { %724 = vst.msk [vmem:[%s980_s27 + $0x80] sm:$0xff] %vm373_vm1, %v505_v12  ;;  %v463_v15 = vpop.f32.mrf.mxu1 }
 0x16b   : > { %734 = vst.msk [vmem:[%s980_s27 + $0xa0] sm:$0xff] %vm373_vm1, %v539_v13  ;;  %v474_v16 = vadd.f32 %v713_v14, %v463_v15 }
 0x16d   : > { %717 = vst.msk [vmem:[%s980_s27 + $0x78] sm:$0xff] %vm373_vm1, %v474_v16 }
 0x16f   : > { %v492_v19 = vpop.f32.mrf.mxu2  ;;  %v526_v20 = vpop.f32.mrf.mxu3 }
 0x170   : > { %v506_v21 = vadd.f32 %v721_v17, %v492_v19  ;;  %v540_v22 = vadd.f32 %v731_v18, %v526_v20 }
 0x172   : > { %725 = vst.msk [vmem:[%s980_s27 + $0x88] sm:$0xff] %vm373_vm1, %v506_v21 }
 0x173   : > { %735 = vst.msk [vmem:[%s980_s27 + $0xa8] sm:$0xff] %vm373_vm1, %v540_v22 }
 0x177   : > { %v495_v25 = vpop.f32.mrf.mxu2  ;;  %v529_v26 = vpop.f32.mrf.mxu3 }
 0x178   : > { %v507_v27 = vadd.f32 %v722_v23, %v495_v25  ;;  %v541_v28 = vadd.f32 %v732_v24, %v529_v26 }
 0x17a   : > { %726 = vst.msk [vmem:[%s980_s27 + $0x90] sm:$0xff] %vm373_vm1, %v507_v27 }
 0x17b   : > { %736 = vst.msk [vmem:[%s980_s27 + $0xb0] sm:$0xff] %vm373_vm1, %v541_v28 }
 0x17f   : > { %v497_v31 = vpop.f32.mrf.mxu2  ;;  %v531_v32 = vpop.f32.mrf.mxu3 }
 0x180   : > { %v508_v33 = vadd.f32 %v723_v29, %v497_v31  ;;  %v542_v34 = vadd.f32 %v733_v30, %v531_v32 }
 0x182   : > { %727 = vst.msk [vmem:[%s980_s27 + $0x98] sm:$0xff] %vm373_vm1, %v508_v33 }
 0x183   : > { %737 = vst.msk [vmem:[%s980_s27 + $0xb8] sm:$0xff] %vm373_vm1, %v542_v34 }
 0x184   : > { %823 = shalt.err (!%p820_p3)
}
 0x185   : > { %s860_s13 = smov 128   ;;  %s861_s22 = smov 8  }
 0x186   : > { %755 = dma.vmem_to_hbm [thread:$0]  (%p925_p5), %s562_s6, 3072, %s564_s19, %s549_s7, %s860_s13, %s860_s13, %s861_s22  }
 0x187 PF: > { %p761_p4 = scmp.ge.s32.totalorder %s858_s18, 2  ;;  %s578_s23 = sand.u32 1, %s846_s15  }
 0x188   : > { %s579_s27 = scalar_lea.sflag [#allocation3], %s578_s23 }
 0x189   : > { %p758_p7 = pnand %p761_p4, %p929_p6 }
 0x18b   : > { %p759_p8 = pneg %p758_p7 }
 0x18d   : > { %841 = dma.done.wait (%p759_p8), %s579_s27, 3072  }
 0x18e   : > { %843 = vsyncadd (%p759_p8), %s579_s27, 4294964224  ;;  %p14_p9 = scmp.ge.s32.totalorder %s912_s21, 4   ;;  %s1094_s15 = smov %s850_s16 }
 0x18f   : > { %s1095_s16 = smov %s854_s17  ;;  %s1096_s17 = smov %s923_s24 }
 0x190   : > { %s1097_s18 = smov %s912_s21  ;;  %16 = sbr.rel (!%p14_p9) target bundleno = 3 (0x3), region = 84 }
 0x195   :  { %585 = vsyncpa [#allocation3], 1 }
 0x196   :  { %587 = vsyncpa [#allocation3 + $0x1], 1 }

</bundles_post_ra>
